<compile_context>
chip_gen: v6e
topology: v6e:2x2x1
jax: 0.10.0
libtpu: 0.0.40
codegen_flags: <defaults>
</compile_context>

<pallas_src>
import jax
import jax.numpy as jnp
from jax.experimental import pallas as pl
from jax.experimental.pallas import tpu as pltpu


_LANES = 128
# Sublane packing multiple per element size (f32: 8, bf16/f16: 16, int8/fp8: 32).
_SUBLANE_MULT = {4: 8, 2: 16, 1: 32}
# Misaligned arrays up to this many bytes are handled as a single full-array
# VMEM block (zero extra HBM passes).
_MISALIGNED_SINGLE_BLOCK_BYTES = 2 * 1024 * 1024


def _parametrisation_kernel(x_ref, o_ref):
    """(1 + cos(x)) / 2 on the VPU.

    bf16 I/O stays in bf16 (native on v6e/v7x, 2x elements per vreg); other
    dtypes are computed in f32 and cast back.
    """
    x = x_ref[...]
    if x.dtype not in (jnp.float32, jnp.bfloat16):
        x = x.astype(jnp.float32)
    o_ref[...] = ((1.0 + jnp.cos(x)) * 0.5).astype(o_ref.dtype)


def _tile_and_vmem_budget():
    """(per-buffer tile bytes, scoped VMEM limit) gated on chip generation."""
    try:
        vmem = getattr(pltpu.get_tpu_info(), "vmem_capacity_bytes", None)
        if vmem is not None and vmem >= 96 * 1024 * 1024:
            # v5e/v6e: 128 MiB physical VMEM -> bigger tiles, fewer grid steps.
            return 8 * 1024 * 1024, 48 << 20
    except Exception:
        pass
    # v7x (64 MiB VMEM per TC) or unknown: conservative setting.
    return 4 * 1024 * 1024, 32 << 20


def _widest_lanes(n):
    """Widest lane count (multiple of 128, up to 2048) dividing n exactly."""
    for cand in (2048, 1024, 512, 256, 128):
        if n % cand == 0:
            return cand
    return None


def _run_tiled_2d(x2d, tile_bytes, vmem_limit, donate):
    """Stream a lane-dense (rows, lanes) slab through double-buffered tiles."""
    rows, lanes = x2d.shape
    dtype = x2d.dtype
    itemsize = jnp.dtype(dtype).itemsize
    sub = _SUBLANE_MULT.get(itemsize, 8)
    max_rows = max(sub, (tile_bytes // (lanes * itemsize)) // sub * sub)
    # Whole array as one block when it fits; otherwise sublane-aligned tiles
    # (Pallas masks the ragged last block).
    tile_rows = rows if rows <= max_rows else max_rows
    grid = (pl.cdiv(rows, tile_rows),)
    return pl.pallas_call(
        _parametrisation_kernel,
        out_shape=jax.ShapeDtypeStruct((rows, lanes), dtype),
        grid=grid,
        in_specs=[pl.BlockSpec((tile_rows, lanes), lambda i: (i, 0))],
        out_specs=pl.BlockSpec((tile_rows, lanes), lambda i: (i, 0)),
        compiler_params=pltpu.CompilerParams(
            dimension_semantics=("parallel",),  # v7x: shard rows over 2 TCs
            vmem_limit_bytes=vmem_limit,
        ),
        input_output_aliases={0: 0} if donate else {},
    )(x2d)


def parametrisation(x: jax.Array, *, donate_input: bool = False,
                    max_tile_bytes: int | None = None,
                    misaligned_single_block_bytes: int = _MISALIGNED_SINGLE_BLOCK_BYTES
                    ) -> jax.Array:
    """Apply (1 + cos(x)) / 2 elementwise via a Pallas TPU kernel.

    donate_input=True aliases the input buffer to the output (use only when the
    caller does not need x afterwards; pair with jit donation for zero-copy).
    """
    orig_shape = x.shape
    dtype = x.dtype
    n = x.size
    if n == 0:
        return x

    tile_bytes, vmem_limit = _tile_and_vmem_budget()
    if max_tile_bytes is not None:
        tile_bytes = max_tile_bytes

    flat = x.reshape(-1)
    itemsize = jnp.dtype(dtype).itemsize

    # Fast path: size is a multiple of 128 -> pure lane-dense streaming, no
    # extra HBM passes, wide unmasked stores.
    if n % _LANES == 0:
        lanes = _widest_lanes(n)
        out = _run_tiled_2d(flat.reshape(n // lanes, lanes),
                            tile_bytes, vmem_limit, donate_input)
        return out.reshape(orig_shape)

    # Misaligned, small: one full-array VMEM block (block_shape == full dims is
    # exempt from the (8,128) rule) -> still zero extra HBM passes.
    if n * itemsize <= misaligned_single_block_bytes:
        out = pl.pallas_call(
            _parametrisation_kernel,
            out_shape=jax.ShapeDtypeStruct((1, n), dtype),
            input_output_aliases={0: 0} if donate_input else {},
        )(flat.reshape(1, n))
        return out.reshape(orig_shape)

    # Misaligned, large (rare): kernel on the 128-aligned prefix; the <128
    # element tail is computed in plain JAX and stitched back on.
    # TODO(synk): the concatenate costs one extra write pass; a ragged 1-D grid
    # with a masked final block would remove it if this path ever gets hot.
    n_main = (n // _LANES) * _LANES
    head, tail = flat[:n_main], flat[n_main:]
    lanes = _widest_lanes(n_main)
    head_out = _run_tiled_2d(head.reshape(n_main // lanes, lanes),
                             tile_bytes, vmem_limit, False).reshape(-1)
    tail_out = ((1.0 + jnp.cos(tail.astype(jnp.float32))) * 0.5).astype(dtype)
    return jnp.concatenate([head_out, tail_out]).reshape(orig_shape)


if __name__ == "__main__":
    key = jax.random.PRNGKey(0)
    k0, k1, k2, k3, k4, k5 = jax.random.split(key, 6)

    def ref_fn(v):
        return (1.0 + jnp.cos(v.astype(jnp.float32))) / 2.0

    # 1) Canonical small NCHW-style input (aligned fast path, single block).
    x0 = jax.random.normal(k0, (2, 4, 16, 16), dtype=jnp.float32)
    out0 = jax.block_until_ready(parametrisation(x0))
    assert out0.shape == x0.shape and out0.dtype == x0.dtype
    assert jnp.allclose(out0, ref_fn(x0), atol=1e-6, rtol=1e-6)

    # 2) Same path with input/output aliasing (reference computed beforehand).
    x1 = jax.random.normal(k1, (2, 4, 16, 16), dtype=jnp.float32)
    ref1 = ref_fn(x1)
    out1 = jax.block_until_ready(parametrisation(x1, donate_input=True))
    assert jnp.allclose(out1, ref1, atol=1e-6, rtol=1e-6)

    # 3) Misaligned size (105 elements): single full-array block, no pad/slice.
    x2 = jax.random.normal(k2, (3, 5, 7), dtype=jnp.float32)
    out2 = jax.block_until_ready(parametrisation(x2))
    assert out2.shape == x2.shape and out2.dtype == x2.dtype
    assert jnp.allclose(out2, ref_fn(x2), atol=1e-6, rtol=1e-6)

    # 4) Misaligned size, forced onto the aligned-prefix + JAX-tail path.
    x3 = jax.random.normal(k3, (1000,), dtype=jnp.float32)
    out3 = jax.block_until_ready(
        parametrisation(x3, misaligned_single_block_bytes=0))
    assert out3.shape == x3.shape and out3.dtype == x3.dtype
    assert jnp.allclose(out3, ref_fn(x3), atol=1e-6, rtol=1e-6)

    # 5) Multi-block tiled path (tile forced small so grid > 1).
    x4 = jax.random.normal(k4, (512, 512), dtype=jnp.float32)
    out4 = jax.block_until_ready(parametrisation(x4, max_tile_bytes=64 * 1024))
    assert jnp.allclose(out4, ref_fn(x4), atol=1e-6, rtol=1e-6)

    # 6) bf16 I/O: computed in bf16 inside the kernel (looser tolerance).
    x5 = jax.random.normal(k5, (4, 64), dtype=jnp.float32).astype(jnp.bfloat16)
    out5 = jax.block_until_ready(parametrisation(x5))
    assert out5.shape == x5.shape and out5.dtype == jnp.bfloat16
    assert jnp.allclose(out5.astype(jnp.float32), ref_fn(x5), atol=5e-2)

    print("KERNEL_OK")
</pallas_src>

<mosaic_0001>
module attributes {stable_mosaic.version = 11 : i64} {
  func.func @_parametrisation_kernel(%arg0: i32, %arg1: memref<1x2048xf32, #tpu.memory_space<vmem>>, %arg2: memref<1x2048xf32, #tpu.memory_space<vmem>>) attributes {dimension_semantics = [#tpu.dimension_semantics<parallel>], iteration_bounds = array<i64: 1>, scalar_prefetch = 0 : i64, scratch_operands = 0 : i64, tpu.core_type = #tpu.core_type<tc>, window_params = [{transform_indices = @transform_0, window_bounds = array<i64: 1, 2048>}, {transform_indices = @transform_1, window_bounds = array<i64: 1, 2048>}]} {
    %c0 = arith.constant 0 : index
    %c0_0 = arith.constant 0 : index
    %0 = vector.load %arg1[%c0, %c0_0] : memref<1x2048xf32, #tpu.memory_space<vmem>>, vector<1x2048xf32>
    %1 = math.cos %0 : vector<1x2048xf32>
    %cst = arith.constant 1.000000e+00 : f32
    %2 = vector.broadcast %cst : f32 to vector<1x2048xf32>
    %3 = arith.addf %2, %1 : vector<1x2048xf32>
    %cst_1 = arith.constant 5.000000e-01 : f32
    %4 = vector.broadcast %cst_1 : f32 to vector<1x2048xf32>
    %5 = arith.mulf %3, %4 : vector<1x2048xf32>
    %c0_2 = arith.constant 0 : index
    %c0_3 = arith.constant 0 : index
    %6 = vector.load %arg2[%c0_2, %c0_3] : memref<1x2048xf32, #tpu.memory_space<vmem>>, vector<1x2048xf32>
    tpu.vector_store %arg2[%c0_2, %c0_3], %5 {strides = array<i32>} : memref<1x2048xf32, #tpu.memory_space<vmem>>, vector<1x2048xf32>,
    return
  }
  func.func @transform_0(%arg0: i32) -> (i32, i32) {
    %c0_i32 = arith.constant 0 : i32
    %c0_i32_0 = arith.constant 0 : i32
    return %arg0, %c0_i32 : i32, i32
  }
  func.func @transform_1(%arg0: i32) -> (i32, i32) {
    %c0_i32 = arith.constant 0 : i32
    %c0_i32_0 = arith.constant 0 : i32
    return %arg0, %c0_i32 : i32, i32
  }
}

</mosaic_0001>

<bundles_post_ra>
// kernel: tpu_custom_call.1
= control target key start
LH: loop header
LB: loop body
LE: loop exit
PB: predicated region body
PF: predicated region fallthrough
CT: control target
= control target key end

     0   :  { %6 = vsyncpa [#allocation3], 0  ;;  %s436_s0 = inlined_call_operand.hbm [shape: f32[1,2048], index: 0, kind: input, shape index: {}]   ;;  %s437_s1 = inlined_call_operand.hbm [shape: f32[1,2048], index: 1, kind: output, shape index: {}]  }
   0x1   :  { %7 = vsyncpa [#allocation4], 0  ;;  %s326_s6 = smov [#allocation2]  }
   0x2   :  { %s14_s7 = sshll.u32 %s326_s6, 4  ;;  %s15_s7 = int_to_ptr.vmem [resolvable:$true] %s14_s7 }
   0x3   :  { %s290_s8 = scalar_lea.vmem %s15_s7, 256  ;;  %p295_p1 = scmp.lt.s32.totalorder %s15_s7, %s15_s7 }
   0x4   :  { %p291_p0 = scmp.ne.s32.totalorder %s15_s7, %s290_s8  ;;  %p296_p2 = scmp.lt.s32.totalorder %s290_s8, %s290_s8 }
   0x6   :  { %p297_p3 = por %p296_p2, %p295_p1 }
   0x8   :  { %p298_p4 = pnand %p297_p3, %p291_p0 }
   0xa   :  { %301 = shalt.err (!%p298_p4)
}
   0xb   :  { %17 = dma.hbm_to_vmem [thread:$0]  %s436_s0, 256, %s15_s7, [#allocation3]  }
   0xc   :  { %322 = dma.done.wait [#allocation3], 256  }
   0xd   :  { %323 = vsyncadd [#allocation3], 4294967040  ;;  %v347_v0 = vld [vmem:[#allocation2] sm:$0xff]  ;;  %v349_v1 = vld [vmem:[#allocation2 + $0x8] sm:$0xff]  ;;  %v327_v24 = vmov 683565275  }
   0xe   :  { %v23_v2 = vand.u32 2147483647, %v347_v0  ;;  %v26_v3 = vand.u32 2139095040, %v347_v0  ;;  %v126_v4 = vand.u32 2147483647, %v349_v1  ;;  %v129_v5 = vand.u32 2139095040, %v349_v1 }
   0xf   :  { %v328_v26 = vmov 2475754826   ;;  %v329_v28 = vmov 2131351028   ;;  %v330_v30 = vmov 2102212464  }
  0x10   :  { %v27_v6 = vshrl.u32 %v26_v3, 23  ;;  %v30_v7 = vand.u32 8388607, %v23_v2  ;;  %v130_v8 = vshrl.u32 %v129_v5, 23  ;;  %v133_v9 = vand.u32 8388607, %v126_v4 }
  0x11   :  { %v331_v32 = vmov 920167782   ;;  %v332_v40 = vmov 1326507024   ;;  %vm25_vm14 = vcmp.lt.s32.totalorder %v347_v0, 0  ;;  %s333_s0 = smov [#allocation5]  }
  0x12   :  { %v250_v10 = vadd.s32 4294967169, %v27_v6  ;;  %v254_v11 = vadd.s32 4294967169, %v130_v8  ;;  %v31_v13 = vor.u32 8388608, %v30_v7  ;;  %v134_v14 = vor.u32 8388608, %v133_v9  ;;  %s241_s11 = sshll.u32 %s333_s0, 4  ;;  %s242_s11 = int_to_ptr.vmem [resolvable:$true] %s241_s11 }
  0x13   :  { %vm410_vm15 = vcmp.le.f32.partialorder %v23_v2, 0.7853982  ;;  %s302_s12 = scalar_lea.vmem %s242_s11, 256  ;;  %p307_p6 = scmp.lt.s32.totalorder %s242_s11, %s242_s11 }
  0x14   :  { %v33_v12 = vadd.s32 1, %v250_v10  ;;  %v136_v15 = vadd.s32 1, %v254_v11  ;;  %v359_v20 = vshll.u32 %v31_v13, 8  ;;  %v361_v22 = vshll.u32 %v134_v14, 8  ;;  %p303_p5 = scmp.ne.s32.totalorder %s242_s11, %s302_s12  ;;  %p308_p7 = scmp.lt.s32.totalorder %s302_s12, %s302_s12 }
  0x16   :  { %vm34_vm0 = vcmp.gt.s32.totalorder %v33_v12, 0  ;;  %vm137_vm1 = vcmp.gt.s32.totalorder %v136_v15, 0  ;;  %p309_p8 = por %p308_p7, %p307_p6 }
  0x17   :  { %v35_v16 = vsel %vm34_vm0, %v33_v12, 0  ;;  %v138_v19 = vsel %vm137_vm1, %v136_v15, 0  ;;  %vm128_vm0 = vcmp.lt.s32.totalorder %v349_v1, 0  ;;  %vm420_vm1 = vcmp.le.f32.partialorder %v126_v4, 0.7853982 }
  0x18   :  { %v36_v17 = vshrl.u32 %v35_v16, 5  ;;  %v37_v18 = vand.u32 31, %v35_v16  ;;  %v140_v21 = vand.u32 31, %v138_v19  ;;  %v363_v34 = vshrl.u32 %v138_v19, 5  ;;  %p310_p9 = pnand %p309_p8, %p303_p5 }
  0x1a   :  { %v38_v23 = vsub.s32 32, %v37_v18  ;;  %v40_v25 = vshll.u32 %v327_v24, %v37_v18  ;;  %v43_v27 = vshll.u32 %v328_v26, %v37_v18  ;;  %v46_v29 = vshll.u32 %v329_v28, %v37_v18 }
  0x1b   :  { %v49_v31 = vshll.u32 %v330_v30, %v37_v18  ;;  %v52_v33 = vshll.u32 %v331_v32, %v37_v18  ;;  %vm55_vm2 = vcmp.lt.s32.totalorder %v36_v17, 1  ;;  %vm56_vm3 = vcmp.lt.s32.totalorder %v36_v17, 2 }
  0x1c   :  { %v39_v35 = vshrl.u32 %v327_v24, %v38_v23  ;;  %v41_v36 = vshrl.u32 %v328_v26, %v38_v23  ;;  %v44_v37 = vshrl.u32 %v329_v28, %v38_v23  ;;  %v47_v38 = vshrl.u32 %v330_v30, %v38_v23 }
  0x1d   :  { %v50_v39 = vshrl.u32 %v331_v32, %v38_v23  ;;  %v53_v41 = vshrl.u32 %v332_v40, %v38_v23  ;;  %vm58_vm4 = vcmp.lt.s32.totalorder %v36_v17, 4  ;;  %v141_v45 = vsub.s32 32, %v140_v21 }
  0x1e   :  { %v42_v42 = vor.u32 %v41_v36, %v40_v25  ;;  %v45_v43 = vor.u32 %v44_v37, %v43_v27  ;;  %v48_v44 = vor.u32 %v47_v38, %v46_v29  ;;  %vm57_vm5 = vcmp.lt.s32.totalorder %v36_v17, 3 }
  0x1f   :  { %v51_v46 = vor.u32 %v50_v39, %v49_v31  ;;  %v54_v47 = vor.u32 %v53_v41, %v52_v33  ;;  %v143_v48 = vshll.u32 %v327_v24, %v140_v21  ;;  %v146_v56 = vshll.u32 %v328_v26, %v140_v21 }
  0x20   :  { %v59_v49 = vsel %vm55_vm2, %v39_v35, %v42_v42  ;;  %v60_v50 = vsel %vm58_vm4, %v48_v44, 2102212464  ;;  %v63_v51 = vsel %vm55_vm2, %v42_v42, %v45_v43  ;;  %v67_v52 = vsel %vm55_vm2, %v45_v43, %v48_v44 }
  0x21   :  { %v61_v53 = vsel %vm57_vm5, %v45_v43, %v60_v50  ;;  %v64_v54 = vsel %vm58_vm4, %v51_v46, 920167782  ;;  %v68_v55 = vsel %vm58_vm4, %v54_v47, 1326507024  ;;  %v142_v59 = vshrl.u32 %v327_v24, %v141_v45 }
  0x22   :  { %v65_v57 = vsel %vm57_vm5, %v48_v44, %v64_v54  ;;  %v69_v58 = vsel %vm57_vm5, %v51_v46, %v68_v55  ;;  %v144_v60 = vshrl.u32 %v328_v26, %v141_v45  ;;  %v62_v61 = vsel %vm56_vm3, %v59_v49, %v61_v53 }
  0x23   :  { %v66_v62 = vsel %vm56_vm3, %v63_v51, %v65_v57  ;;  %v70_v63 = vsel %vm56_vm3, %v67_v52, %v69_v58  ;;  %v147_v3 = vshrl.u32 %v329_v28, %v141_v45  ;;  %v149_v11 = vshll.u32 %v329_v28, %v140_v21 }
  0x24   :  { %v372_v5 = vmul.u32.u64.low %v359_v20, %v70_v63  ;;  %v373_v6 = vmul.u32.u64.high %v359_v20, %v70_v63, %v372_v5  ;;  %v376_v7 = vmul.u32.u64.low %v359_v20, %v66_v62  ;;  %v377_v8 = vmul.u32.u64.high %v359_v20, %v66_v62, %v376_v7 }
  0x25   :  { %v145_v9 = vor.u32 %v144_v60, %v143_v48  ;;  %v148_v10 = vor.u32 %v147_v3, %v146_v56  ;;  %v150_v12 = vshrl.u32 %v330_v30, %v141_v45  ;;  %v152_v13 = vshll.u32 %v330_v30, %v140_v21 }
  0x26   :  { %v153_v14 = vshrl.u32 %v331_v32, %v141_v45  ;;  %v155_v15 = vshll.u32 %v331_v32, %v140_v21  ;;  %v156_v16 = vshrl.u32 %v332_v40, %v141_v45  ;;  %v78_v17 = vmul.u32 %v359_v20, %v62_v61 }
  0x27   :  { %v151_v18 = vor.u32 %v150_v12, %v149_v11  ;;  %vm158_vm6 = vcmp.lt.s32.totalorder %v363_v34, 1  ;;  %vm159_vm7 = vcmp.lt.s32.totalorder %v363_v34, 2  ;;  %vm80_vm8 = vc.u32 %v373_v6, %v376_v7 }
  0x28   :  { %v81_v19 = vadd.s32 1, %v377_v8  ;;  %v154_v23 = vor.u32 %v153_v14, %v152_v13  ;;  %vm160_vm9 = vcmp.lt.s32.totalorder %v363_v34, 3  ;;  %v157_v24 = vor.u32 %v156_v16, %v155_v15 }
  0x29   :  { %vm161_vm10 = vcmp.lt.s32.totalorder %v363_v34, 4  ;;  %v162_v25 = vsel %vm158_vm6, %v142_v59, %v145_v9  ;;  %v166_v21 = vsel %vm158_vm6, %v145_v9, %v148_v10  ;;  %v170_v28 = vsel %vm158_vm6, %v148_v10, %v151_v18 }
  0x2a   :  { %v82_v26 = vsel %vm80_vm8, %v81_v19, %v377_v8  ;;  %v163_v20 = vsel %vm161_vm10, %v151_v18, 2102212464  ;;  %v167_v27 = vsel %vm161_vm10, %v154_v23, 920167782  ;;  %v171_v32 = vsel %vm161_vm10, %v157_v24, 1326507024 }
  0x2b   :  { %v83_v29 = vadd.s32 %v82_v26, %v78_v17  ;;  %v164_v30 = vsel %vm160_vm9, %v148_v10, %v163_v20  ;;  %v168_v31 = vsel %vm160_vm9, %v151_v18, %v167_v27  ;;  %v172_v36 = vsel %vm160_vm9, %v154_v23, %v171_v32 }
  0x2c   :  { %v165_v33 = vsel %vm159_vm7, %v162_v25, %v164_v30  ;;  %v169_v35 = vsel %vm159_vm7, %v166_v21, %v168_v31  ;;  %v173_v38 = vsel %vm159_vm7, %v170_v28, %v172_v36  ;;  %v79_v57 = vadd.s32 %v376_v7, %v373_v6 }
  0x2d   :  { %v84_v37 = vadd.s32 536870912, %v83_v29  ;;  %v394_v39 = vmul.u32.u64.low %v361_v22, %v169_v35  ;;  %v395_v40 = vmul.u32.u64.high %v361_v22, %v169_v35, %v394_v39  ;;  %v181_v44 = vmul.u32 %v361_v22, %v165_v33 }
  0x2e   :  { %v398_v41 = vmul.u32.u64.low %v361_v22, %v173_v38  ;;  %v399_v42 = vmul.u32.u64.high %v361_v22, %v173_v38, %v398_v41  ;;  %vm115_vm5 = vweird.f32 %v347_v0  ;;  %vm218_vm9 = vweird.f32 %v349_v1 }
  0x2f   :  { %v85_v43 = vshrl.u32 %v84_v37, 30  ;;  %v184_v46 = vadd.s32 1, %v395_v40 }
  0x30   :  { %vm183_vm11 = vc.u32 %v399_v42, %v394_v39  ;;  %v182_v13 = vadd.s32 %v394_v39, %v399_v42 }
  0x31   :  { %v86_v45 = vshll.u32 %v85_v43, 30  ;;  %v185_v34 = vsel %vm183_vm11, %v184_v46, %v395_v40  ;;  %v109_v20 = vsub.s32 4, %v85_v43 }
  0x32   :  { %v186_v48 = vadd.s32 %v185_v34, %v181_v44 }
  0x33   :  { %v87_v47 = vsub.s32 %v83_v29, %v86_v45  ;;  %v110_v31 = vsel %vm25_vm14, %v109_v20, %v85_v43 }
  0x34   :  { %v187_v50 = vadd.s32 536870912, %v186_v48  ;;  %v112_v35 = vsel %vm410_vm15, 0, %v110_v31 }
  0x35   :  { %v89_v49 = vsub.s32 0, %v87_v47  ;;  %v116_v39 = vand.u32 3, %v112_v35 }
  0x36   :  { %v188_v52 = vshrl.u32 %v187_v50, 30 }
  0x37   :  { %v251_v51 = vmin.u32 %v89_v49, %v87_v47  ;;  %vm121_vm2 = vcmp.eq.s32.totalorder %v116_v39, 2  ;;  %vm118_vm3 = vcmp.eq.s32.totalorder %v116_v39, 0  ;;  %vm117_vm4 = vcmp.lt.s32.totalorder %v116_v39, 2 }
  0x38   :  { %v189_v54 = vshll.u32 %v188_v52, 30  ;;  %v212_v37 = vsub.s32 4, %v188_v52 }
  0x39   :  { %v91_v53 = vclz %v251_v51 }
  0x3a   :  { %v190_v56 = vsub.s32 %v186_v48, %v189_v54  ;;  %v213_v40 = vsel %vm128_vm0, %v212_v37, %v188_v52 }
  0x3b   :  { %v252_v55 = vadd.s32 4294967294, %v91_v53  ;;  %v215_v44 = vsel %vm420_vm1, 0, %v213_v40 }
  0x3c   :  { %v192_v58 = vsub.s32 0, %v190_v56  ;;  %v219_v34 = vand.u32 3, %v215_v44 }
  0x3d   :  { %vm253_vm12 = vcmp.lt.s32.totalorder %v252_v55, 0 }
  0x3e   :  { %v94_v22 = vsel %vm253_vm12, 0, %v252_v55  ;;  %v255_v62 = vmin.u32 %v192_v58, %v190_v56  ;;  %vm224_vm6 = vcmp.eq.s32.totalorder %v219_v34, 2  ;;  %vm221_vm7 = vcmp.eq.s32.totalorder %v219_v34, 0 }
  0x3f   :  { %v95_v59 = vsub.s32 32, %v94_v22  ;;  %v96_v60 = vshll.u32 %v87_v47, %v94_v22  ;;  %v99_v61 = vsub.s32 4294967266, %v94_v22  ;;  %vm220_vm8 = vcmp.lt.s32.totalorder %v219_v34, 2 }
  0x40   :  { %v194_v5 = vclz %v255_v62 }
  0x41   :  { %v97_v63 = vshrl.u32 %v79_v57, %v95_v59  ;;  %v100_v3 = vadd.s32 127, %v99_v61 }
  0x42   :  { %v256_v10 = vadd.s32 4294967294, %v194_v5 }
  0x43   :  { %v98_v8 = vor.u32 %v97_v63, %v96_v60  ;;  %v101_v9 = vshll.u32 %v100_v3, 23 }
  0x44   :  { %vm257_vm13 = vcmp.lt.s32.totalorder %v256_v10, 0 }
  0x45   :  { %v102_v11 = vor.u32 4788187, %v101_v9  ;;  %v105_v12 = vcvt.s32.f32 %v98_v8  ;;  %v197_v6 = vsel %vm257_vm13, 0, %v256_v10 }
  0x46   :  { %v198_v7 = vsub.s32 32, %v197_v6  ;;  %v199_v15 = vshll.u32 %v190_v56, %v197_v6  ;;  %v202_v16 = vsub.s32 4294967266, %v197_v6 }
  0x47   :  { %v103_v14 = vand.u32 2147483647, %v102_v11 }
  0x48   :  { %v200_v18 = vshrl.u32 %v182_v13, %v198_v7  ;;  %v203_v19 = vadd.s32 127, %v202_v16 }
  0x49   :  { %v106_v17 = vmul.f32 %v105_v12, %v103_v14 }
  0x4a   :  { %v201_v25 = vor.u32 %v200_v18, %v199_v15  ;;  %v204_v21 = vshll.u32 %v203_v19, 23 }
  0x4b   :  { %v107_v24 = vxor.u32 2147483648, %v106_v17 }
  0x4c   :  { %v205_v28 = vor.u32 4788187, %v204_v21  ;;  %v208_v29 = vcvt.s32.f32 %v201_v25 }
  0x4d   :  { %v108_v26 = vsel %vm25_vm14, %v107_v24, %v106_v17 }
  0x4e   :  { %v111_v27 = vsel %vm410_vm15, %v347_v0, %v108_v26  ;;  %v206_v30 = vand.u32 2147483647, %v205_v28 }
  0x4f   :  { %274 = vcosq.f32 %v111_v27 }
  0x50   :  { %276 = vsinq.f32 %v111_v27  ;;  %v209_v32 = vmul.f32 %v208_v29, %v206_v30 }
  0x52   :  { %v210_v33 = vxor.u32 2147483648, %v209_v32 }
  0x54   :  { %v211_v36 = vsel %vm128_vm0, %v210_v33, %v209_v32 }
  0x55   :  { %v214_v38 = vsel %vm420_vm1, %v349_v1, %v211_v36 }
  0x56   :  { %278 = vcosq.f32 %v214_v38 }
  0x57   :  { %280 = vsinq.f32 %v214_v38 }
  0x5c   :  { %v275_v41 = vpop.eup %274 }
  0x5d   :  { %v277_v4 = vpop.eup %276  ;;  %v122_v42 = vxor.u32 2147483648, %v275_v41 }
  0x5e   :  { %v119_v43 = vxor.u32 2147483648, %v277_v4 }
  0x5f   :  { %v123_v45 = vsel %vm121_vm2, %v122_v42, %v277_v4 }
  0x60   :  { %v120_v46 = vsel %vm118_vm3, %v275_v41, %v119_v43 }
  0x61   :  { %v124_v47 = vsel %vm117_vm4, %v120_v46, %v123_v45 }
  0x62   :  { %v125_v48 = vsel %vm115_vm5, nan, %v124_v47 }
  0x63   :  { %v229_v49 = vadd.f32 1.0, %v125_v48  ;;  %v279_v50 = vpop.eup %278 }
  0x64   :  { %v281_v52 = vpop.eup %280  ;;  %v225_v53 = vxor.u32 2147483648, %v279_v50 }
  0x65   :  { %v231_v51 = vmul.f32 0.5, %v229_v49  ;;  %v222_v54 = vxor.u32 2147483648, %v281_v52 }
  0x66   :  { %v226_v55 = vsel %vm224_vm6, %v225_v53, %v281_v52 }
  0x67   :  { %233 = vst [vmem:[#allocation5] sm:$0xff] %v231_v51  ;;  %v223_v56 = vsel %vm221_vm7, %v279_v50, %v222_v54 }
  0x68   :  { %v227_v0 = vsel %vm220_vm8, %v223_v56, %v226_v55 }
  0x69   :  { %v228_v57 = vsel %vm218_vm9, nan, %v227_v0 }
  0x6a   :  { %v230_v22 = vadd.f32 1.0, %v228_v57 }
  0x6c   :  { %v232_v58 = vmul.f32 0.5, %v230_v22 }
  0x6e   :  { %234 = vst [vmem:[#allocation5 + $0x8] sm:$0xff] %v232_v58 }
  0x6f   :  { %313 = shalt.err (!%p310_p9)
}
  0x70   :  { %244 = dma.vmem_to_hbm [thread:$0]  %s242_s11, 256, %s437_s1, [#allocation4]  }
  0x71   :  { %324 = dma.done.wait [#allocation4], 256  }
  0x72   :  { %325 = vsyncadd [#allocation4], 4294967040 }
  0x73   :  { %248 = vsyncpa [#allocation3], 1 }
  0x74   :  { %249 = vsyncpa [#allocation4], 1 }

</bundles_post_ra>
